<compile_context>
chip_gen: v7x
topology: tpu7x:2x2x1
jax: 0.10.0
libtpu: 0.0.40
codegen_flags: <defaults>
</compile_context>

<pallas_src>
import functools

import jax
import jax.numpy as jnp
from jax.experimental import pallas as pl
from jax.experimental.pallas import tpu as pltpu

IN_FEATURES = 81
HIDDEN = 16
NUM_CLASSES = 10

_LANE = 128


def _round_up(n, m):
    return ((n + m - 1) // m) * m


def _default_tile_b():
    """Per-generation batch tile for this HBM-bandwidth-bound kernel."""
    try:
        kind = jax.devices()[0].device_kind.lower()
    except Exception:
        kind = ""
    # v5e (~0.82 TB/s HBM) is firmly DMA-bound; 8192 keeps the padded,
    # double-buffered footprint ~20 MiB.  v6e/v7x: 16384 halves the share of the
    # ~0.35us/step pipeline overhead.
    if "v5" in kind:
        return 8192
    return 16384


def mlp_kernel(x_ref, w1_ref, b1_ref, w2_ref, b2_ref, o_ref):
    # x is streamed as f32 (single HBM read of the input); cast to bf16
    # in-register right before the MXU feed.
    x = x_ref[...].astype(jnp.bfloat16)
    # layer1: (TILE_B,81)bf16 @ (81,16)bf16 -> f32 accumulate, bias add in f32.
    h = jnp.dot(x, w1_ref[...], preferred_element_type=jnp.float32)
    h = h + b1_ref[...]
    # dropout(p=0.5): identity in inference/eval mode.
    # TODO(synk): training-mode dropout would mask-and-scale with
    # pltpu.prng_seed + pltpu.stateful_bernoulli.
    # Cast to bf16 *before* tanh: halves EUP vreg ops on v6e/v7x (bf16 EUP) and
    # the bf16 cast is required for the second MXU dot anyway.  Only added error
    # is the benign bf16 quantization of tanh's input (bias add stayed f32).
    h = jnp.tanh(h.astype(jnp.bfloat16))
    # layer3: bf16 operands, f32 accumulate, f32 bias add.
    out = jnp.dot(h, w2_ref[...], preferred_element_type=jnp.float32)
    out = out + b2_ref[...]
    o_ref[...] = out.astype(o_ref.dtype)


@functools.partial(jax.jit, static_argnames=("tile_b", "out_dtype"))
def _mlp_forward(x, w1, b1, w2, b2, *, tile_b, out_dtype):
    B, K = x.shape
    C = w2.shape[1]

    # Keep at least 2 grid steps where possible (so v7x's second TensorCore gets
    # work under the "parallel" batch axis) and never allocate a tile taller
    # than the 128-rounded batch.
    tile_b = min(tile_b, _round_up(pl.cdiv(B, 2), _LANE))
    tile_b = max(tile_b, _LANE)
    # Ragged B: Pallas clamps/pads the edge block; OOB rows never hit HBM on the
    # store and rows are independent, so no explicit padding/slicing needed.
    grid = (pl.cdiv(B, tile_b),)

    # Weights/biases are tiny and VMEM-resident (constant index_maps): bf16
    # weights feed the MXU directly, f32 biases keep the adds in f32.
    w1b = w1.astype(jnp.bfloat16)
    w2b = w2.astype(jnp.bfloat16)

    # Real double-buffered VMEM footprint: the 81- and C-wide blocks each pad to
    # 128 lanes in VMEM.
    x_block_bytes = tile_b * _round_up(K, _LANE) * 4
    o_block_bytes = tile_b * _round_up(C, _LANE) * jnp.dtype(out_dtype).itemsize
    vmem_limit = 2 * (x_block_bytes + o_block_bytes) + (4 << 20)  # + headroom
    vmem_limit = max(vmem_limit, 32 << 20)  # harmless floor, < v7x's 64 MiB phys

    return pl.pallas_call(
        mlp_kernel,
        out_shape=jax.ShapeDtypeStruct((B, C), out_dtype),
        grid=grid,
        in_specs=[
            # x streamed per tile (f32; cast in-kernel -> no extra HBM pass).
            # v5e note: if profiling shows exposed DMA, sweep
            # pipeline_mode=pl.Buffered(3) on this spec.
            pl.BlockSpec((tile_b, K), lambda i: (i, 0)),
            pl.BlockSpec((K, HIDDEN), lambda i: (0, 0)),   # w1: resident
            pl.BlockSpec((1, HIDDEN), lambda i: (0, 0)),   # b1: resident
            pl.BlockSpec((HIDDEN, C), lambda i: (0, 0)),   # w2: resident
            pl.BlockSpec((1, C), lambda i: (0, 0)),        # b2: resident
        ],
        out_specs=pl.BlockSpec((tile_b, C), lambda i: (i, 0)),
        compiler_params=pltpu.CompilerParams(
            # Batch tiles are independent -> shard across v7x's 2 TensorCores;
            # harmless no-op on single-core v5e/v6e.
            dimension_semantics=("parallel",),
            vmem_limit_bytes=int(vmem_limit),
        ),
    )(x, w1b, b1, w2b, b2)


def mlp_forward(x, w1, b1, w2, b2, *, tile_b=None, out_dtype=jnp.float32):
    """MLP_ forward.  x: (B, 81) f32.  w1: (81,16), b1: (1,16), w2: (16,C), b2: (1,C).

    out_dtype=jnp.bfloat16 halves output store vregs / write bytes / out VMEM
    (largest win on v7x); default f32 matches the PyTorch module.
    """
    if tile_b is None:
        tile_b = _default_tile_b()
    return _mlp_forward(x, w1, b1, w2, b2, tile_b=int(tile_b),
                        out_dtype=jnp.dtype(out_dtype).type)


def init_params(key):
    # Mimic PyTorch nn.Linear default init: U(-1/sqrt(fan_in), +1/sqrt(fan_in)).
    # Weights stored pre-transposed as (in_features, out_features) so the kernel
    # does x @ W + b (identical math to PyTorch's x @ W.T + b).
    k1, k2, k3, k4 = jax.random.split(key, 4)
    bound1 = 1.0 / jnp.sqrt(jnp.float32(IN_FEATURES))
    bound2 = 1.0 / jnp.sqrt(jnp.float32(HIDDEN))
    w1 = jax.random.uniform(k1, (IN_FEATURES, HIDDEN), jnp.float32, -bound1, bound1)
    b1 = jax.random.uniform(k2, (1, HIDDEN), jnp.float32, -bound1, bound1)
    w2 = jax.random.uniform(k3, (HIDDEN, NUM_CLASSES), jnp.float32, -bound2, bound2)
    b2 = jax.random.uniform(k4, (1, NUM_CLASSES), jnp.float32, -bound2, bound2)
    return w1, b1, w2, b2


if __name__ == "__main__":
    key = jax.random.PRNGKey(0)
    k_x, k_p = jax.random.split(key)

    # B=300: the auto-capped tile (256) gives a 2-step grid with a ragged
    # (clamped) edge block -- exercises both the pipeline and the edge path.
    # (For workloads this tiny XLA's fused matmul would match; the kernel is
    #  meant for B in the thousands.)
    B = 300
    x = jax.random.normal(k_x, (B, IN_FEATURES), jnp.float32)
    w1, b1, w2, b2 = init_params(k_p)

    out = mlp_forward(x, w1, b1, w2, b2)
    jax.block_until_ready(out)
    assert out.shape == (B, NUM_CLASSES)
    assert out.dtype == jnp.float32

    # Reference mirroring the kernel's bf16-operand / f32-accumulate numerics
    # (bf16 quantization of tanh's input and output, f32 bias adds).
    xb = x.astype(jnp.bfloat16).astype(jnp.float32)
    w1b = w1.astype(jnp.bfloat16).astype(jnp.float32)
    w2b = w2.astype(jnp.bfloat16).astype(jnp.float32)
    h_pre = (xb @ w1b + b1).astype(jnp.bfloat16).astype(jnp.float32)
    h_ref = jnp.tanh(h_pre).astype(jnp.bfloat16).astype(jnp.float32)
    ref_bf16 = h_ref @ w2b + b2
    assert jnp.allclose(out, ref_bf16, atol=2e-2, rtol=2e-2), float(
        jnp.max(jnp.abs(out - ref_bf16)))

    # Looser semantic check against the pure-f32 PyTorch-equivalent forward.
    ref_f32 = jnp.tanh(x @ w1 + b1) @ w2 + b2
    assert jnp.allclose(out, ref_f32, atol=6e-2, rtol=6e-2), float(
        jnp.max(jnp.abs(out - ref_f32)))

    print("KERNEL_OK")
</pallas_src>

<mosaic_0001>
module attributes {stable_mosaic.version = 11 : i64} {
  func.func @mlp_kernel(%arg0: i32, %arg1: memref<256x81xf32, #tpu.memory_space<vmem>>, %arg2: memref<81x16xbf16, #tpu.memory_space<vmem>>, %arg3: memref<1x16xf32, #tpu.memory_space<vmem>>, %arg4: memref<16x10xbf16, #tpu.memory_space<vmem>>, %arg5: memref<1x10xf32, #tpu.memory_space<vmem>>, %arg6: memref<256x10xf32, #tpu.memory_space<vmem>>) attributes {dimension_semantics = [#tpu.dimension_semantics<parallel>], iteration_bounds = array<i64: 2>, scalar_prefetch = 0 : i64, scratch_operands = 0 : i64, tpu.core_type = #tpu.core_type<tc>, window_params = [{transform_indices = @transform_0, window_bounds = array<i64: 256, 81>}, {pipeline_mode = #tpu.pipeline_mode<synchronous>, transform_indices = @transform_1, window_bounds = array<i64: 81, 16>}, {pipeline_mode = #tpu.pipeline_mode<synchronous>, transform_indices = @transform_2, window_bounds = array<i64: 1, 16>}, {pipeline_mode = #tpu.pipeline_mode<synchronous>, transform_indices = @transform_3, window_bounds = array<i64: 16, 10>}, {pipeline_mode = #tpu.pipeline_mode<synchronous>, transform_indices = @transform_4, window_bounds = array<i64: 1, 10>}, {transform_indices = @transform_5, window_bounds = array<i64: 256, 10>}]} {
    %c0 = arith.constant 0 : index
    %c0_0 = arith.constant 0 : index
    %0 = vector.load %arg1[%c0, %c0_0] : memref<256x81xf32, #tpu.memory_space<vmem>>, vector<256x81xf32>
    %1 = arith.truncf %0 : vector<256x81xf32> to vector<256x81xbf16>
    %c0_1 = arith.constant 0 : index
    %c0_2 = arith.constant 0 : index
    %2 = vector.load %arg2[%c0_1, %c0_2] : memref<81x16xbf16, #tpu.memory_space<vmem>>, vector<81x16xbf16>
    %cst = arith.constant dense<0.000000e+00> : vector<256x16xf32>
    %3 = tpu.matmul %1, %2, %cst {dimension_numbers = #tpu.dot_dimension_numbers<[1], [0], [0], [1], [0, 0, 1, 1], [], []>} : vector<256x81xbf16>, vector<81x16xbf16>, vector<256x16xf32> -> vector<256x16xf32>
    %c0_3 = arith.constant 0 : index
    %c0_4 = arith.constant 0 : index
    %4 = vector.load %arg3[%c0_3, %c0_4] : memref<1x16xf32, #tpu.memory_space<vmem>>, vector<1x16xf32>
    %5 = vector.broadcast %4 : vector<1x16xf32> to vector<256x16xf32>
    %6 = arith.addf %3, %5 : vector<256x16xf32>
    %7 = arith.truncf %6 : vector<256x16xf32> to vector<256x16xbf16>
    %8 = math.tanh %7 : vector<256x16xbf16>
    %c0_5 = arith.constant 0 : index
    %c0_6 = arith.constant 0 : index
    %9 = vector.load %arg4[%c0_5, %c0_6] : memref<16x10xbf16, #tpu.memory_space<vmem>>, vector<16x10xbf16>
    %cst_7 = arith.constant dense<0.000000e+00> : vector<256x10xf32>
    %10 = tpu.matmul %8, %9, %cst_7 {dimension_numbers = #tpu.dot_dimension_numbers<[1], [0], [0], [1], [0, 0, 1, 1], [], []>} : vector<256x16xbf16>, vector<16x10xbf16>, vector<256x10xf32> -> vector<256x10xf32>
    %c0_8 = arith.constant 0 : index
    %c0_9 = arith.constant 0 : index
    %11 = vector.load %arg5[%c0_8, %c0_9] : memref<1x10xf32, #tpu.memory_space<vmem>>, vector<1x10xf32>
    %12 = vector.broadcast %11 : vector<1x10xf32> to vector<256x10xf32>
    %13 = arith.addf %10, %12 : vector<256x10xf32>
    %c0_10 = arith.constant 0 : index
    %c0_11 = arith.constant 0 : index
    %14 = vector.load %arg6[%c0_10, %c0_11] : memref<256x10xf32, #tpu.memory_space<vmem>>, vector<256x10xf32>
    tpu.vector_store %arg6[%c0_10, %c0_11], %13 {strides = array<i32>} : memref<256x10xf32, #tpu.memory_space<vmem>>, vector<256x10xf32>,
    return
  }
  func.func @transform_0(%arg0: i32) -> (i32, i32) {
    %c0_i32 = arith.constant 0 : i32
    %c0_i32_0 = arith.constant 0 : i32
    return %arg0, %c0_i32 : i32, i32
  }
  func.func @transform_1(%arg0: i32) -> (i32, i32) {
    %c0_i32 = arith.constant 0 : i32
    %c0_i32_0 = arith.constant 0 : i32
    %c0_i32_1 = arith.constant 0 : i32
    return %c0_i32, %c0_i32_0 : i32, i32
  }
  func.func @transform_2(%arg0: i32) -> (i32, i32) {
    %c0_i32 = arith.constant 0 : i32
    %c0_i32_0 = arith.constant 0 : i32
    %c0_i32_1 = arith.constant 0 : i32
    return %c0_i32, %c0_i32_0 : i32, i32
  }
  func.func @transform_3(%arg0: i32) -> (i32, i32) {
    %c0_i32 = arith.constant 0 : i32
    %c0_i32_0 = arith.constant 0 : i32
    %c0_i32_1 = arith.constant 0 : i32
    return %c0_i32, %c0_i32_0 : i32, i32
  }
  func.func @transform_4(%arg0: i32) -> (i32, i32) {
    %c0_i32 = arith.constant 0 : i32
    %c0_i32_0 = arith.constant 0 : i32
    %c0_i32_1 = arith.constant 0 : i32
    return %c0_i32, %c0_i32_0 : i32, i32
  }
  func.func @transform_5(%arg0: i32) -> (i32, i32) {
    %c0_i32 = arith.constant 0 : i32
    %c0_i32_0 = arith.constant 0 : i32
    return %arg0, %c0_i32 : i32, i32
  }
}

</mosaic_0001>

<bundles_post_ra>
// kernel: _mlp_forward.1
= control target key start
LH: loop header
LB: loop body
LE: loop exit
PB: predicated region body
PF: predicated region fallthrough
CT: control target
= control target key end

     0   :  { %s1623_s18 = smov 0   ;;  %s1625_s19 = smov 0   ;;  %s2027_s0 = inlined_call_operand.vmem [shape: f32[300,81], index: 0, kind: input, shape index: {}]   ;;  %s2028_s1 = inlined_call_operand.vmem [shape: bf16[81,16], index: 1, kind: input, shape index: {}]   ;;  %s2029_s2 = inlined_call_operand.vmem [shape: f32[1,16], index: 2, kind: input, shape index: {}]   ;;  %s2030_s3 = inlined_call_operand.vmem [shape: bf16[16,10], index: 3, kind: input, shape index: {}]   ;;  %s2031_s4 = inlined_call_operand.vmem [shape: f32[1,10], index: 4, kind: input, shape index: {}]   ;;  %s2032_s5 = inlined_call_operand.vmem [shape: f32[300,10], index: 5, kind: output, shape index: {}]  }
   0x1   :  { %s1627_s20 = smov 0  }
   0x2 LB: > { %s1636_s21 = sadd.s32 4294967295, %s1558_s20   ;;  %s1638_s22 = sadd.s32 1, %s1558_s20   ;;  %s1558_s20 = sphi %s1627_s20, %s2041_s20   ;;  %s1554_s19 = sphi %s1625_s19, %s2040_s19   ;;  %s1550_s18 = sphi %s1623_s18, %s2039_s18  }
   0x3   : > { %s129_s23 = ssub.s32 %s1558_s20, %s1638_s22  ;;  %s132_s24 = sadd.s32 1, %s1554_s19 }
   0x4   : > { %p130_p0 = scmp.eq.s32.totalorder %s129_s23, 0  ;;  %p142_p1 = scmp.ne.s32.totalorder %s1554_s19, %s1550_s18 }
   0x5   : > { %p143_p2 = scmp.eq.s32.totalorder %s1636_s21, 1  ;;  %p1194_p3 = scmp.ge.s32.totalorder %s1558_s20, 1 }
   0x6   : > { %s1646_s25 = scalar_select %p130_p0, %s1554_s19, %s132_s24  }
   0x7   : > { %p1648_p4 = por %p143_p2, %p142_p1  ;;  %p196_p5 = scmp.lt.s32.totalorder %s1558_s20, 3 }
   0x9   : > { %p197_p6 = pnand %p1194_p3, %p196_p5 }
   0xa   : > { %v1465_v0 = vld [vmem:[%s2028_s1] sm:$0xff] (!%p197_p6)   ;;  %v1466_v1 = vld [vmem:[%s2028_s1 + $0x8] sm:$0xff] (!%p197_p6)   ;;  %s1659_s6 = sshll.u32 (!%p197_p6), %s1636_s21, 5  ;;  %v1467_v2 = vld [vmem:[%s2028_s1 + $0x10] sm:$0xff] (!%p197_p6)   ;;  %vm395_vm0 = vcmask (!%p197_p6), 1040384   ;;  %vm346_vm1 = vcmask (!%p197_p6), 662528  }
   0xb   : > { %200 = sbr.rel (%p197_p6) target bundleno = 597 (0x255), region = 40  ;;  %1298 = vmatprep.subr.bf16.mxu0 (!%p197_p6), %v1465_v0  ;;  %p232_p7 = scmp.lt.s32.totalorder (!%p197_p6), %s1659_s6, 37  ;;  %v1468_v3 = vld [vmem:[%s2028_s1 + $0x18] sm:$0xff] (!%p197_p6)   ;;  %v1469_v7 = vld [vmem:[%s2028_s1 + $0x20] sm:$0xff] (!%p197_p6)   ;;  %v1592_v9 = vmov (!%p197_p6), 0   ;;  %vm609_vm2 = vcmask (!%p197_p6), 130048  }
   0xc   : > { %1299 = vmatpush3.bf16.msra.mxu0 (!%p197_p6), %v1465_v0  ;;  %v1470_v8 = vld [vmem:[%s2028_s1 + $0x28] ss:$0 sps:$4 sm:$0x11] (!%p197_p6)   ;;  %v397_v10 = vsel (!%p197_p6), %vm395_vm0, 65535, %v1592_v9  ;;  %v1471_v57 = vld [vmem:[%s2030_s3] sm:$0xff] (!%p197_p6)   ;;  %s224_s30 = sand.u32 (!%p197_p6), 1, %s1550_s18  }
   0xd   : > { %1300 = vmatprep.subr.bf16.mxu0 (!%p197_p6), %v1466_v1  ;;  %v399_v11 = vand.u32 (!%p197_p6), %v1470_v8, %v397_v10  ;;  %1342 = vmatprep.subr.bf16.mxu1 (!%p197_p6), %v1471_v57  ;;  %v1734_v59 = vld [vmem:[%s2029_s2] ss:$0 sm:$0xff] (!%p197_p6)  ;;  %s1195_s7 = sshll.u32 (!%p197_p6), %s224_s30, 8  ;;  %vm819_vm3 = vcmask (!%p197_p6), 80896  }
   0xe   : > { %1343 = vmatpush3.bf16.msra.mxu1 (!%p197_p6), %v1471_v57  ;;  %s1792_s10 = scalar_lea.vmem (!%p197_p6), [#allocation2], %s1195_s7  }
  0x10   : > { %1301 = vmatpush3.bf16.msra.mxu0 (!%p197_p6), %v1466_v1 }
  0x11   : > { %1302 = vmatprep.subr.bf16.mxu0 (!%p197_p6), %v1467_v2 }
  0x12   : > { %s233_s9 = scalar_select %p232_p7, %s1659_s6, 37 }
  0x13   : > { %s860_s18 = ssub.s32 (%p1648_p4), 38, %s1659_s6  ;;  %s1256_s11 = sshll.u32 (%p1648_p4), %s1636_s21, 8 }
  0x14   : > { %s1197_s12 = sshll.u32 %s233_s9, 3  ;;  %1303 = vmatpush3.bf16.msra.mxu0 %v1467_v2  ;;  %p861_p8 = scmp.lt.s32.totalorder (%p1648_p4), %s860_s18, 32 }
  0x15   : > { %s1672_s15 = scalar_lea.vmem %s2027_s0, %s1197_s12  ;;  %1304 = vmatprep.subr.bf16.mxu0 %v1468_v3  ;;  %s1895_s14 = scalar_lea.vmem (%p1648_p4), %s2032_s5, %s1256_s11  }
  0x16   : > { %v247_v4 = vld [vmem:[%s1672_s15] sm:$0xff]  ;;  %v248_v5 = vld [vmem:[%s1672_s15 + $0x8] sm:$0xff]  ;;  %v249_v12 = vld [vmem:[%s1672_s15 + $0x10] sm:$0xff] }
  0x17   : > { %v279_v6 = vpack.c.bf16 %v248_v5, %v247_v4  ;;  %v250_v13 = vld [vmem:[%s1672_s15 + $0x18] sm:$0xff]  ;;  %v251_v14 = vld [vmem:[%s1672_s15 + $0x20] sm:$0xff]  ;;  %v252_v15 = vld [vmem:[%s1672_s15 + $0x28] sm:$0xff] }
  0x18   : > { %1305 = vmatpush3.bf16.msra.mxu0 %v1468_v3  ;;  %v280_v16 = vpack.c.bf16 %v250_v13, %v249_v12  ;;  %v281_v17 = vpack.c.bf16 %v252_v15, %v251_v14  ;;  %v253_v18 = vld [vmem:[%s1672_s15 + $0x30] sm:$0xff]  ;;  %v254_v19 = vld [vmem:[%s1672_s15 + $0x38] sm:$0xff]  ;;  %v255_v20 = vld [vmem:[%s1672_s15 + $0x40] sm:$0xff] }
  0x19   : > { %1310 = vmatprep.mubr.msk.bf16.mxu0 %vm346_vm1, %v279_v6  ;;  %1306 = vmatprep.subr.bf16.mxu0 %v1469_v7  ;;  %v256_v21 = vld [vmem:[%s1672_s15 + $0x48] sm:$0xff]  ;;  %v282_v22 = vpack.c.bf16 %v254_v19, %v253_v18  ;;  %v257_v24 = vld [vmem:[%s1672_s15 + $0x50] sm:$0xff]  ;;  %v258_v25 = vld [vmem:[%s1672_s15 + $0x58] sm:$0xff] }
  0x1a   : > { %v283_v23 = vpack.c.bf16 %v256_v21, %v255_v20  ;;  %v259_v26 = vld [vmem:[%s1672_s15 + $0x60] sm:$0xff]  ;;  %v260_v27 = vld [vmem:[%s1672_s15 + $0x68] sm:$0xff]  ;;  %v284_v28 = vpack.c.bf16 %v258_v25, %v257_v24  ;;  %v261_v30 = vld [vmem:[%s1672_s15 + $0x70] sm:$0xff] }
  0x1b   : > { %v285_v29 = vpack.c.bf16 %v260_v27, %v259_v26  ;;  %v262_v31 = vld [vmem:[%s1672_s15 + $0x78] sm:$0xff]  ;;  %v263_v32 = vld [vmem:[%s1672_s15 + $0x80] sm:$0xff]  ;;  %v264_v33 = vld [vmem:[%s1672_s15 + $0x88] sm:$0xff] }
  0x1c   : > { %1307 = vmatpush3.bf16.msra.mxu0 %v1469_v7  ;;  %v286_v34 = vpack.c.bf16 %v262_v31, %v261_v30  ;;  %v287_v35 = vpack.c.bf16 %v264_v33, %v263_v32  ;;  %v265_v36 = vld [vmem:[%s1672_s15 + $0x90] sm:$0xff]  ;;  %v266_v37 = vld [vmem:[%s1672_s15 + $0x98] sm:$0xff]  ;;  %v267_v38 = vld [vmem:[%s1672_s15 + $0xa0] sm:$0xff] }
  0x1d   : > { %1308 = vmatprep.subr.bf16.mxu0 %v399_v11  ;;  %v268_v39 = vld [vmem:[%s1672_s15 + $0xa8] sm:$0xff]  ;;  %v288_v40 = vpack.c.bf16 %v266_v37, %v265_v36  ;;  %v269_v42 = vld [vmem:[%s1672_s15 + $0xb0] sm:$0xff]  ;;  %v270_v43 = vld [vmem:[%s1672_s15 + $0xb8] sm:$0xff] }
  0x1e   : > { %v289_v41 = vpack.c.bf16 %v268_v39, %v267_v38  ;;  %v271_v44 = vld [vmem:[%s1672_s15 + $0xc0] sm:$0xff]  ;;  %v272_v45 = vld [vmem:[%s1672_s15 + $0xc8] sm:$0xff]  ;;  %v290_v46 = vpack.c.bf16 %v270_v43, %v269_v42  ;;  %v273_v48 = vld [vmem:[%s1672_s15 + $0xd0] sm:$0xff] }
  0x1f   : > { %v291_v47 = vpack.c.bf16 %v272_v45, %v271_v44  ;;  %v274_v49 = vld [vmem:[%s1672_s15 + $0xd8] sm:$0xff]  ;;  %v275_v50 = vld [vmem:[%s1672_s15 + $0xe0] sm:$0xff]  ;;  %v276_v51 = vld [vmem:[%s1672_s15 + $0xe8] sm:$0xff] }
  0x20   : > { %1309 = vmatpush3.bf16.msra.mxu0 %v399_v11  ;;  %v292_v52 = vpack.c.bf16 %v274_v49, %v273_v48  ;;  %v293_v53 = vpack.c.bf16 %v276_v51, %v275_v50  ;;  %v277_v54 = vld [vmem:[%s1672_s15 + $0xf0] sm:$0xff]  ;;  %v278_v55 = vld [vmem:[%s1672_s15 + $0xf8] sm:$0xff] }
  0x21   : > { %v294_v56 = vpack.c.bf16 %v278_v55, %v277_v54 }
  0x23   : > { %1311 = vmatmul.mubr.msk.bf16.vlgmr.msra.gmra.mrb[0].mxu0 %vm346_vm1, %v280_v16 }
  0x24   : > { %1314 = vmatprep.mubr.msk.bf16.mxu0 %vm346_vm1, %v281_v17 }
  0x2b   : > { %1315 = vmatmul.mubr.msk.bf16.gmra.mrb[4].mxu0 %vm346_vm1, %v282_v22 }
  0x2c   : > { %1318 = vmatprep.mubr.msk.bf16.mxu0 %vm346_vm1, %v283_v23 }
  0x33   : > { %1319 = vmatmul.mubr.msk.bf16.gmra.mrb[8].mxu0 %vm346_vm1, %v284_v28 }
  0x34   : > { %1322 = vmatprep.mubr.msk.bf16.mxu0 %vm346_vm1, %v285_v29 }
  0x3b   : > { %1323 = vmatmul.mubr.msk.bf16.gmra.mrb[12].mxu0 %vm346_vm1, %v286_v34 }
  0x3c   : > { %1326 = vmatprep.mubr.msk.bf16.mxu0 %vm346_vm1, %v287_v35 }
  0x43   : > { %1327 = vmatmul.mubr.msk.bf16.gmra.mrb[16].mxu0 %vm346_vm1, %v288_v40 }
  0x44   : > { %1330 = vmatprep.mubr.msk.bf16.mxu0 %vm346_vm1, %v289_v41 }
  0x4b   : > { %1331 = vmatmul.mubr.msk.bf16.gmra.mrb[20].mxu0 %vm346_vm1, %v290_v46 }
  0x4c   : > { %1334 = vmatprep.mubr.msk.bf16.mxu0 %vm346_vm1, %v291_v47 }
  0x53   : > { %1335 = vmatmul.mubr.msk.bf16.gmra.mrb[24].mxu0 %vm346_vm1, %v292_v52 }
  0x54   : > { %1338 = vmatprep.mubr.msk.bf16.mxu0 %vm346_vm1, %v293_v53 }
  0x5b   : > { %1339 = vmatmul.mubr.msk.bf16.gmra.mrb[28].mxu0 %vm346_vm1, %v294_v56 }
  0xf6   : > { %v1312_v58 = vpop.f32.mrb[0].mxu0 }
  0xf7   : > { %v435_v60 = vpop.f32.mrb[1].mxu0  ;;  %v444_v62 = vadd.f32 %v1312_v58, %v1734_v59 }
  0xf8   : > { %v1313_v61 = vpop.f32.mrb[2].mxu0  ;;  %v436_v1 = vadd.f32 %v1734_v59, %v435_v60 }
  0xf9   : > { %v447_v63 = vadd.f32 %v1313_v61, %v1734_v59  ;;  %v438_v0 = vpop.f32.mrb[3].mxu0 }
  0xfa   : > { %v439_v2 = vadd.f32 %v1734_v59, %v438_v0 }
  0xfb   : > { %v563_v3 = vpack.c.bf16 %v447_v63, %v444_v62 }
  0xfc   : > { %v562_v4 = vpack.c.bf16 %v439_v2, %v436_v1 }
  0xfe   : > { %1472 = vtanh.bf16 %v562_v4  ;;  %v1316_v5 = vpop.f32.mrb[4].mxu0 }
  0xff   : > { %1474 = vtanh.bf16 %v563_v3  ;;  %v451_v6 = vpop.f32.mrb[5].mxu0  ;;  %v460_v8 = vadd.f32 %v1316_v5, %v1734_v59 }
 0x100   : > { %v1317_v7 = vpop.f32.mrb[6].mxu0  ;;  %v452_v11 = vadd.f32 %v1734_v59, %v451_v6 }
 0x101   : > { %v463_v9 = vadd.f32 %v1317_v7, %v1734_v59  ;;  %v454_v10 = vpop.f32.mrb[7].mxu0 }
 0x102   : > { %v455_v12 = vadd.f32 %v1734_v59, %v454_v10 }
 0x103   : > { %v565_v13 = vpack.c.bf16 %v463_v9, %v460_v8 }
 0x104   : > { %v564_v14 = vpack.c.bf16 %v455_v12, %v452_v11 }
 0x106   : > { %1476 = vtanh.bf16 %v564_v14  ;;  %v1320_v15 = vpop.f32.mrb[8].mxu0 }
 0x107   : > { %1478 = vtanh.bf16 %v565_v13  ;;  %v467_v16 = vpop.f32.mrb[9].mxu0  ;;  %v476_v19 = vadd.f32 %v1320_v15, %v1734_v59 }
 0x108   : > { %v1321_v17 = vpop.f32.mrb[10].mxu0  ;;  %v468_v23 = vadd.f32 %v1734_v59, %v467_v16 }
 0x109   : > { %v1473_v18 = vpop.eup %1472  ;;  %v479_v20 = vadd.f32 %v1321_v17, %v1734_v59  ;;  %v470_v21 = vpop.f32.mrb[11].mxu0 }
 0x10a   : > { %v1475_v22 = vpop.eup %1474  ;;  %v471_v24 = vadd.f32 %v1734_v59, %v470_v21  ;;  %1344 = vmatprep.mubr.msk.bf16.mxu1 %vm609_vm2, %v1473_v18 }
 0x10b   : > { %v567_v25 = vpack.c.bf16 %v479_v20, %v476_v19  ;;  %1345 = vmatmul.mubr.msk.bf16.vlgmr.msra.gmra.mrb[0].mxu1 %vm609_vm2, %v1475_v22 }
 0x10c   : > { %v566_v26 = vpack.c.bf16 %v471_v24, %v468_v23 }
 0x10e   : > { %1480 = vtanh.bf16 %v566_v26  ;;  %v1324_v27 = vpop.f32.mrb[12].mxu0 }
 0x10f   : > { %1482 = vtanh.bf16 %v567_v25  ;;  %v483_v28 = vpop.f32.mrb[13].mxu0  ;;  %v492_v31 = vadd.f32 %v1324_v27, %v1734_v59 }
 0x110   : > { %v1325_v29 = vpop.f32.mrb[14].mxu0  ;;  %v484_v35 = vadd.f32 %v1734_v59, %v483_v28 }
 0x111   : > { %v1477_v30 = vpop.eup %1476  ;;  %v495_v32 = vadd.f32 %v1325_v29, %v1734_v59  ;;  %v486_v33 = vpop.f32.mrb[15].mxu0 }
 0x112   : > { %v1479_v34 = vpop.eup %1478  ;;  %v487_v36 = vadd.f32 %v1734_v59, %v486_v33  ;;  %1348 = vmatprep.mubr.msk.bf16.mxu1 %vm609_vm2, %v1477_v30 }
 0x113   : > { %v569_v37 = vpack.c.bf16 %v495_v32, %v492_v31  ;;  %1349 = vmatmul.mubr.msk.bf16.gmra.mrb[4].mxu1 %vm609_vm2, %v1479_v34 }
 0x114   : > { %v568_v38 = vpack.c.bf16 %v487_v36, %v484_v35 }
 0x116   : > { %1484 = vtanh.bf16 %v568_v38  ;;  %v1328_v39 = vpop.f32.mrb[16].mxu0 }
 0x117   : > { %1486 = vtanh.bf16 %v569_v37  ;;  %v499_v40 = vpop.f32.mrb[17].mxu0  ;;  %v508_v43 = vadd.f32 %v1328_v39, %v1734_v59 }
 0x118   : > { %v1329_v41 = vpop.f32.mrb[18].mxu0  ;;  %v500_v47 = vadd.f32 %v1734_v59, %v499_v40 }
 0x119   : > { %v1481_v42 = vpop.eup %1480  ;;  %v511_v44 = vadd.f32 %v1329_v41, %v1734_v59  ;;  %v502_v45 = vpop.f32.mrb[19].mxu0 }
 0x11a   : > { %v1483_v46 = vpop.eup %1482  ;;  %v503_v48 = vadd.f32 %v1734_v59, %v502_v45  ;;  %1352 = vmatprep.mubr.msk.bf16.mxu1 %vm609_vm2, %v1481_v42 }
 0x11b   : > { %v571_v49 = vpack.c.bf16 %v511_v44, %v508_v43  ;;  %1353 = vmatmul.mubr.msk.bf16.gmra.mrb[8].mxu1 %vm609_vm2, %v1483_v46 }
 0x11c   : > { %v570_v50 = vpack.c.bf16 %v503_v48, %v500_v47 }
 0x11e   : > { %1488 = vtanh.bf16 %v570_v50  ;;  %v1332_v51 = vpop.f32.mrb[20].mxu0 }
 0x11f   : > { %1490 = vtanh.bf16 %v571_v49  ;;  %v515_v52 = vpop.f32.mrb[21].mxu0  ;;  %v524_v55 = vadd.f32 %v1332_v51, %v1734_v59 }
 0x120   : > { %v1333_v53 = vpop.f32.mrb[22].mxu0  ;;  %v516_v60 = vadd.f32 %v1734_v59, %v515_v52 }
 0x121   : > { %v1485_v54 = vpop.eup %1484  ;;  %v527_v56 = vadd.f32 %v1333_v53, %v1734_v59  ;;  %v518_v57 = vpop.f32.mrb[23].mxu0 }
 0x122   : > { %v1487_v58 = vpop.eup %1486  ;;  %v519_v61 = vadd.f32 %v1734_v59, %v518_v57  ;;  %1356 = vmatprep.mubr.msk.bf16.mxu1 %vm609_vm2, %v1485_v54 }
 0x123   : > { %v573_v62 = vpack.c.bf16 %v527_v56, %v524_v55  ;;  %1357 = vmatmul.mubr.msk.bf16.gmra.mrb[12].mxu1 %vm609_vm2, %v1487_v58 }
 0x124   : > { %v572_v63 = vpack.c.bf16 %v519_v61, %v516_v60 }
 0x126   : > { %1492 = vtanh.bf16 %v572_v63  ;;  %v1336_v0 = vpop.f32.mrb[24].mxu0 }
 0x127   : > { %1494 = vtanh.bf16 %v573_v62  ;;  %v531_v1 = vpop.f32.mrb[25].mxu0  ;;  %v540_v4 = vadd.f32 %v1336_v0, %v1734_v59 }
 0x128   : > { %v1337_v2 = vpop.f32.mrb[26].mxu0  ;;  %v532_v8 = vadd.f32 %v1734_v59, %v531_v1 }
 0x129   : > { %v1489_v3 = vpop.eup %1488  ;;  %v543_v5 = vadd.f32 %v1337_v2, %v1734_v59  ;;  %v534_v6 = vpop.f32.mrb[27].mxu0 }
 0x12a   : > { %v1491_v7 = vpop.eup %1490  ;;  %v535_v9 = vadd.f32 %v1734_v59, %v534_v6  ;;  %1360 = vmatprep.mubr.msk.bf16.mxu1 %vm609_vm2, %v1489_v3 }
 0x12b   : > { %v575_v10 = vpack.c.bf16 %v543_v5, %v540_v4  ;;  %1361 = vmatmul.mubr.msk.bf16.gmra.mrb[16].mxu1 %vm609_vm2, %v1491_v7 }
 0x12c   : > { %v574_v11 = vpack.c.bf16 %v535_v9, %v532_v8 }
 0x12e   : > { %1496 = vtanh.bf16 %v574_v11  ;;  %v1340_v12 = vpop.f32.mrb[28].mxu0 }
 0x12f   : > { %1498 = vtanh.bf16 %v575_v10  ;;  %v547_v13 = vpop.f32.mrb[29].mxu0  ;;  %v556_v16 = vadd.f32 %v1340_v12, %v1734_v59 }
 0x130   : > { %v1341_v14 = vpop.f32.mrb[30].mxu0  ;;  %v548_v20 = vadd.f32 %v1734_v59, %v547_v13 }
 0x131   : > { %v1493_v15 = vpop.eup %1492  ;;  %v559_v17 = vadd.f32 %v1341_v14, %v1734_v59  ;;  %v550_v18 = vpop.f32.mrb[31].mxu0 }
 0x132   : > { %v1495_v19 = vpop.eup %1494  ;;  %v551_v21 = vadd.f32 %v1734_v59, %v550_v18  ;;  %1364 = vmatprep.mubr.msk.bf16.mxu1 %vm609_vm2, %v1493_v15  ;;  %v1788_v59 = vld [vmem:[%s2031_s4] ss:$0 sm:$0xff] }
 0x133   : > { %v577_v22 = vpack.c.bf16 %v559_v17, %v556_v16  ;;  %1365 = vmatmul.mubr.msk.bf16.gmra.mrb[20].mxu1 %vm609_vm2, %v1495_v19 }
 0x134   : > { %v576_v23 = vpack.c.bf16 %v551_v21, %v548_v20 }
 0x136   : > { %1500 = vtanh.bf16 %v576_v23 }
 0x137   : > { %1502 = vtanh.bf16 %v577_v22 }
 0x139   : > { %v1497_v24 = vpop.eup %1496 }
 0x13a   : > { %v1499_v25 = vpop.eup %1498  ;;  %1368 = vmatprep.mubr.msk.bf16.mxu1 %vm609_vm2, %v1497_v24 }
 0x13b   : > { %1369 = vmatmul.mubr.msk.bf16.gmra.mrb[24].mxu1 %vm609_vm2, %v1499_v25 }
 0x141   : > { %v1501_v26 = vpop.eup %1500 }
 0x142   : > { %v1503_v27 = vpop.eup %1502  ;;  %1372 = vmatprep.mubr.msk.bf16.mxu1 %vm609_vm2, %v1501_v26 }
 0x143   : > { %1373 = vmatmul.mubr.msk.bf16.gmra.mrb[28].mxu1 %vm609_vm2, %v1503_v27 }
 0x1de   : > { %v1346_v28 = vpop.f32.mrb[0].mxu1 }
 0x1df   : > { %v701_v29 = vadd.f32 %v1346_v28, %v1788_v59  ;;  %v692_v30 = vpop.f32.mrb[1].mxu1 }
 0x1e0   : > { %v693_v31 = vadd.f32 %v1788_v59, %v692_v30  ;;  %v1347_v32 = vpop.f32.mrb[2].mxu1 }
 0x1e1   : > { %822 = vst.msk [vmem:[%s1792_s10 + $0x10] sm:$0xff] %vm819_vm3, %v701_v29  ;;  %v704_v33 = vadd.f32 %v1347_v32, %v1788_v59  ;;  %v695_v34 = vpop.f32.mrb[3].mxu1 }
 0x1e2   : > { %820 = vst.msk [vmem:[%s1792_s10] sm:$0xff] %vm819_vm3, %v693_v31  ;;  %v696_v35 = vadd.f32 %v1788_v59, %v695_v34 }
 0x1e3   : > { %823 = vst.msk [vmem:[%s1792_s10 + $0x18] sm:$0xff] %vm819_vm3, %v704_v33 }
 0x1e4   : > { %821 = vst.msk [vmem:[%s1792_s10 + $0x8] sm:$0xff] %vm819_vm3, %v696_v35 }
 0x1e6   : > { %v1350_v36 = vpop.f32.mrb[4].mxu1 }
 0x1e7   : > { %v717_v37 = vadd.f32 %v1350_v36, %v1788_v59  ;;  %v708_v38 = vpop.f32.mrb[5].mxu1 }
 0x1e8   : > { %v709_v39 = vadd.f32 %v1788_v59, %v708_v38  ;;  %v1351_v40 = vpop.f32.mrb[6].mxu1 }
 0x1e9   : > { %826 = vst.msk [vmem:[%s1792_s10 + $0x30] sm:$0xff] %vm819_vm3, %v717_v37  ;;  %v720_v41 = vadd.f32 %v1351_v40, %v1788_v59  ;;  %v711_v42 = vpop.f32.mrb[7].mxu1 }
 0x1ea   : > { %824 = vst.msk [vmem:[%s1792_s10 + $0x20] sm:$0xff] %vm819_vm3, %v709_v39  ;;  %v712_v43 = vadd.f32 %v1788_v59, %v711_v42 }
 0x1eb   : > { %827 = vst.msk [vmem:[%s1792_s10 + $0x38] sm:$0xff] %vm819_vm3, %v720_v41 }
 0x1ec   : > { %825 = vst.msk [vmem:[%s1792_s10 + $0x28] sm:$0xff] %vm819_vm3, %v712_v43 }
 0x1ee   : > { %v1354_v44 = vpop.f32.mrb[8].mxu1 }
 0x1ef   : > { %v733_v45 = vadd.f32 %v1354_v44, %v1788_v59  ;;  %v724_v46 = vpop.f32.mrb[9].mxu1 }
 0x1f0   : > { %v725_v47 = vadd.f32 %v1788_v59, %v724_v46  ;;  %v1355_v48 = vpop.f32.mrb[10].mxu1 }
 0x1f1   : > { %830 = vst.msk [vmem:[%s1792_s10 + $0x50] sm:$0xff] %vm819_vm3, %v733_v45  ;;  %v736_v49 = vadd.f32 %v1355_v48, %v1788_v59  ;;  %v727_v50 = vpop.f32.mrb[11].mxu1 }
 0x1f2   : > { %828 = vst.msk [vmem:[%s1792_s10 + $0x40] sm:$0xff] %vm819_vm3, %v725_v47  ;;  %v728_v51 = vadd.f32 %v1788_v59, %v727_v50 }
 0x1f3   : > { %831 = vst.msk [vmem:[%s1792_s10 + $0x58] sm:$0xff] %vm819_vm3, %v736_v49 }
 0x1f4   : > { %829 = vst.msk [vmem:[%s1792_s10 + $0x48] sm:$0xff] %vm819_vm3, %v728_v51 }
 0x1f6   : > { %v1358_v52 = vpop.f32.mrb[12].mxu1 }
 0x1f7   : > { %v749_v53 = vadd.f32 %v1358_v52, %v1788_v59  ;;  %v740_v54 = vpop.f32.mrb[13].mxu1 }
 0x1f8   : > { %v741_v55 = vadd.f32 %v1788_v59, %v740_v54  ;;  %v1359_v56 = vpop.f32.mrb[14].mxu1 }
 0x1f9   : > { %834 = vst.msk [vmem:[%s1792_s10 + $0x70] sm:$0xff] %vm819_vm3, %v749_v53  ;;  %v752_v57 = vadd.f32 %v1359_v56, %v1788_v59  ;;  %v743_v58 = vpop.f32.mrb[15].mxu1 }
 0x1fa   : > { %832 = vst.msk [vmem:[%s1792_s10 + $0x60] sm:$0xff] %vm819_vm3, %v741_v55  ;;  %v744_v60 = vadd.f32 %v1788_v59, %v743_v58 }
 0x1fb   : > { %835 = vst.msk [vmem:[%s1792_s10 + $0x78] sm:$0xff] %vm819_vm3, %v752_v57 }
 0x1fc   : > { %833 = vst.msk [vmem:[%s1792_s10 + $0x68] sm:$0xff] %vm819_vm3, %v744_v60 }
 0x1fe   : > { %v1362_v61 = vpop.f32.mrb[16].mxu1 }
 0x1ff   : > { %v765_v62 = vadd.f32 %v1362_v61, %v1788_v59  ;;  %v756_v63 = vpop.f32.mrb[17].mxu1 }
 0x200   : > { %v757_v0 = vadd.f32 %v1788_v59, %v756_v63  ;;  %v1363_v1 = vpop.f32.mrb[18].mxu1 }
 0x201   : > { %838 = vst.msk [vmem:[%s1792_s10 + $0x90] sm:$0xff] %vm819_vm3, %v765_v62  ;;  %v768_v2 = vadd.f32 %v1363_v1, %v1788_v59  ;;  %v759_v3 = vpop.f32.mrb[19].mxu1 }
 0x202   : > { %836 = vst.msk [vmem:[%s1792_s10 + $0x80] sm:$0xff] %vm819_vm3, %v757_v0  ;;  %v760_v4 = vadd.f32 %v1788_v59, %v759_v3 }
 0x203   : > { %839 = vst.msk [vmem:[%s1792_s10 + $0x98] sm:$0xff] %vm819_vm3, %v768_v2 }
 0x204   : > { %837 = vst.msk [vmem:[%s1792_s10 + $0x88] sm:$0xff] %vm819_vm3, %v760_v4 }
 0x206   : > { %v1366_v5 = vpop.f32.mrb[20].mxu1 }
 0x207   : > { %v781_v6 = vadd.f32 %v1366_v5, %v1788_v59  ;;  %v772_v7 = vpop.f32.mrb[21].mxu1 }
 0x208   : > { %v773_v8 = vadd.f32 %v1788_v59, %v772_v7  ;;  %v1367_v9 = vpop.f32.mrb[22].mxu1 }
 0x209   : > { %842 = vst.msk [vmem:[%s1792_s10 + $0xb0] sm:$0xff] %vm819_vm3, %v781_v6  ;;  %v784_v10 = vadd.f32 %v1367_v9, %v1788_v59  ;;  %v775_v11 = vpop.f32.mrb[23].mxu1 }
 0x20a   : > { %840 = vst.msk [vmem:[%s1792_s10 + $0xa0] sm:$0xff] %vm819_vm3, %v773_v8  ;;  %v776_v12 = vadd.f32 %v1788_v59, %v775_v11 }
 0x20b   : > { %843 = vst.msk [vmem:[%s1792_s10 + $0xb8] sm:$0xff] %vm819_vm3, %v784_v10 }
 0x20c   : > { %841 = vst.msk [vmem:[%s1792_s10 + $0xa8] sm:$0xff] %vm819_vm3, %v776_v12 }
 0x20e   : > { %v1370_v13 = vpop.f32.mrb[24].mxu1 }
 0x20f   : > { %v797_v14 = vadd.f32 %v1370_v13, %v1788_v59  ;;  %v788_v15 = vpop.f32.mrb[25].mxu1 }
 0x210   : > { %v789_v16 = vadd.f32 %v1788_v59, %v788_v15  ;;  %v1371_v17 = vpop.f32.mrb[26].mxu1 }
 0x211   : > { %846 = vst.msk [vmem:[%s1792_s10 + $0xd0] sm:$0xff] %vm819_vm3, %v797_v14  ;;  %v800_v18 = vadd.f32 %v1371_v17, %v1788_v59  ;;  %v791_v19 = vpop.f32.mrb[27].mxu1 }
 0x212   : > { %844 = vst.msk [vmem:[%s1792_s10 + $0xc0] sm:$0xff] %vm819_vm3, %v789_v16  ;;  %v792_v20 = vadd.f32 %v1788_v59, %v791_v19 }
 0x213   : > { %847 = vst.msk [vmem:[%s1792_s10 + $0xd8] sm:$0xff] %vm819_vm3, %v800_v18 }
 0x214   : > { %845 = vst.msk [vmem:[%s1792_s10 + $0xc8] sm:$0xff] %vm819_vm3, %v792_v20 }
 0x216   : > { %v1374_v21 = vpop.f32.mrb[28].mxu1  ;;  %858 = sbr.rel (!%p1648_p4) target bundleno = 597 (0x255), region = 44 }
 0x217   : > { %v813_v22 = vadd.f32 %v1374_v21, %v1788_v59  ;;  %v804_v23 = vpop.f32.mrb[29].mxu1 }
 0x218   : > { %v805_v24 = vadd.f32 %v1788_v59, %v804_v23  ;;  %v1375_v25 = vpop.f32.mrb[30].mxu1 }
 0x219   : > { %850 = vst.msk [vmem:[%s1792_s10 + $0xf0] sm:$0xff] %vm819_vm3, %v813_v22  ;;  %v816_v26 = vadd.f32 %v1375_v25, %v1788_v59  ;;  %v807_v27 = vpop.f32.mrb[31].mxu1 }
 0x21a   : > { %848 = vst.msk [vmem:[%s1792_s10 + $0xe0] sm:$0xff] %vm819_vm3, %v805_v24  ;;  %v808_v28 = vadd.f32 %v1788_v59, %v807_v27 }
 0x21b   : > { %851 = vst.msk [vmem:[%s1792_s10 + $0xf8] sm:$0xff] %vm819_vm3, %v816_v26 }
 0x21c   : > { %849 = vst.msk [vmem:[%s1792_s10 + $0xe8] sm:$0xff] %vm819_vm3, %v808_v28 }
 0x21d   : > { %s2043_s18 = smov (!%p861_p8, %s860_s18), 32 }
 0x21e   : > { %s1241_s15 = sshll.u32 %s2043_s18, 7 }
 0x21f   : > { %p1244_p9 = scmp.eq.s32.totalorder %s1241_s15, 0 }
 0x220   : > { %s1901_s16 = sshrl.u32 (!%p1244_p9), %s2043_s18, 5 }
 0x221   : > { %869 = sbr.rel (%p1244_p9) target bundleno = 597 (0x255), region = 48  ;;  %p1245_p10 = scmp.le.s32.totalorder (!%p1244_p9), %s1901_s16, 0 }
 0x228   : > { %1147 = sbr.rel (%p1245_p10) target bundleno = 576 (0x240), region = 124  ;;  %s2034_s21 = smov (!%p1245_p10), %s1895_s14 }
 0x229   : > { %s2035_s26 = smov (!%p1245_p10), %s1792_s10  ;;  %s1910_s6 = smov (!%p1245_p10), 0  }
 0x22a   : > { %s1912_s17 = smov (!%p1245_p10), 0  }
 0x22f LB: >> { %v993_v59 = vld [vmem:[%s1566_s26] sm:$0xff]  ;;  %v995_v29 = vld [vmem:[%s1566_s26 + $0x8] sm:$0xff]  ;;  %v997_v30 = vld [vmem:[%s1566_s26 + $0x10] sm:$0xff]  ;;  %s1057_s20 = sadd.s32 1, %s1570_s6  ;;  %s987_s17 = sadd.s32 1, %s1574_s17   ;;  %s1574_s17 = sphi %s1912_s17, %s987_s17   ;;  %s1570_s6 = sphi %s1910_s6, %s2038_s6   ;;  %s1566_s26 = sphi %s2035_s26, %s2037_s26   ;;  %s1562_s21 = sphi %s2034_s21, %s2036_s21  }
 0x230   : >> { %994 = vst [vmem:[%s1562_s21] sm:$0xff] %v993_v59  ;;  %996 = vst [vmem:[%s1562_s21 + $0x8] sm:$0xff] %v995_v29  ;;  %v999_v31 = vld [vmem:[%s1566_s26 + $0x18] sm:$0xff]  ;;  %v1001_v32 = vld [vmem:[%s1566_s26 + $0x20] sm:$0xff]  ;;  %p1058_p11 = scmp.ge.s32.totalorder %s1057_s20, %s1901_s16  ;;  %p986_p12 = scmp.ge.s32.totalorder %s987_s17, %s1901_s16 }
 0x231   : >> { %998 = vst [vmem:[%s1562_s21 + $0x10] sm:$0xff] %v997_v30  ;;  %v1003_v33 = vld [vmem:[%s1566_s26 + $0x28] sm:$0xff]  ;;  %1000 = vst [vmem:[%s1562_s21 + $0x18] sm:$0xff] %v999_v31  ;;  %v1005_v34 = vld [vmem:[%s1566_s26 + $0x30] sm:$0xff] }
 0x232   : >> { %1002 = vst [vmem:[%s1562_s21 + $0x20] sm:$0xff] %v1001_v32  ;;  %1004 = vst [vmem:[%s1562_s21 + $0x28] sm:$0xff] %v1003_v33  ;;  %v1007_v35 = vld [vmem:[%s1566_s26 + $0x38] sm:$0xff]  ;;  %v1009_v36 = vld [vmem:[%s1566_s26 + $0x40] sm:$0xff]  ;;  %s2045_s20 = smov (%p1058_p11, %s1057_s20), 0 }
 0x233   : >> { %1006 = vst [vmem:[%s1562_s21 + $0x30] sm:$0xff] %v1005_v34  ;;  %1008 = vst [vmem:[%s1562_s21 + $0x38] sm:$0xff] %v1007_v35  ;;  %v1011_v37 = vld [vmem:[%s1566_s26 + $0x48] sm:$0xff]  ;;  %v1013_v38 = vld [vmem:[%s1566_s26 + $0x50] sm:$0xff]  ;;  %s1246_s23 = sshll.u32 %s2045_s20, 8  ;;  %s2038_s6 = smov %s2045_s20 }
 0x234   : >> { %1010 = vst [vmem:[%s1562_s21 + $0x40] sm:$0xff] %v1009_v36  ;;  %v1015_v39 = vld [vmem:[%s1566_s26 + $0x58] sm:$0xff]  ;;  %1012 = vst [vmem:[%s1562_s21 + $0x48] sm:$0xff] %v1011_v37  ;;  %v1017_v40 = vld [vmem:[%s1566_s26 + $0x60] sm:$0xff]  ;;  %s1968_s24 = scalar_lea.vmem %s1792_s10, %s1246_s23 [#allocation2]   ;;  %s1063_s27 = scalar_lea.vmem %s1895_s14, %s1246_s23  }
 0x235   : >> { %1014 = vst [vmem:[%s1562_s21 + $0x50] sm:$0xff] %v1013_v38  ;;  %1016 = vst [vmem:[%s1562_s21 + $0x58] sm:$0xff] %v1015_v39  ;;  %v1019_v41 = vld [vmem:[%s1566_s26 + $0x68] sm:$0xff]  ;;  %v1021_v42 = vld [vmem:[%s1566_s26 + $0x70] sm:$0xff] }
 0x236   : >> { %1018 = vst [vmem:[%s1562_s21 + $0x60] sm:$0xff] %v1017_v40  ;;  %1020 = vst [vmem:[%s1562_s21 + $0x68] sm:$0xff] %v1019_v41  ;;  %v1023_v43 = vld [vmem:[%s1566_s26 + $0x78] sm:$0xff]  ;;  %v1025_v44 = vld [vmem:[%s1566_s26 + $0x80] sm:$0xff] }
 0x237   : >> { %1022 = vst [vmem:[%s1562_s21 + $0x70] sm:$0xff] %v1021_v42  ;;  %v1027_v45 = vld [vmem:[%s1566_s26 + $0x88] sm:$0xff]  ;;  %1024 = vst [vmem:[%s1562_s21 + $0x78] sm:$0xff] %v1023_v43  ;;  %v1029_v46 = vld [vmem:[%s1566_s26 + $0x90] sm:$0xff] }
 0x238   : >> { %1026 = vst [vmem:[%s1562_s21 + $0x80] sm:$0xff] %v1025_v44  ;;  %1028 = vst [vmem:[%s1562_s21 + $0x88] sm:$0xff] %v1027_v45  ;;  %v1031_v47 = vld [vmem:[%s1566_s26 + $0x98] sm:$0xff]  ;;  %v1033_v48 = vld [vmem:[%s1566_s26 + $0xa0] sm:$0xff] }
 0x239   : >> { %1030 = vst [vmem:[%s1562_s21 + $0x90] sm:$0xff] %v1029_v46  ;;  %1032 = vst [vmem:[%s1562_s21 + $0x98] sm:$0xff] %v1031_v47  ;;  %v1035_v49 = vld [vmem:[%s1566_s26 + $0xa8] sm:$0xff]  ;;  %v1037_v50 = vld [vmem:[%s1566_s26 + $0xb0] sm:$0xff]  ;;  %989 = sbr.rel (!%p986_p12) target bundleno = 559 (0x22f), region = 130 }
 0x23a   : >> { %1034 = vst [vmem:[%s1562_s21 + $0xa0] sm:$0xff] %v1033_v48  ;;  %v1039_v51 = vld [vmem:[%s1566_s26 + $0xb8] sm:$0xff]  ;;  %1036 = vst [vmem:[%s1562_s21 + $0xa8] sm:$0xff] %v1035_v49  ;;  %v1041_v52 = vld [vmem:[%s1566_s26 + $0xc0] sm:$0xff] }
 0x23b   : >> { %1038 = vst [vmem:[%s1562_s21 + $0xb0] sm:$0xff] %v1037_v50  ;;  %1040 = vst [vmem:[%s1562_s21 + $0xb8] sm:$0xff] %v1039_v51  ;;  %v1043_v53 = vld [vmem:[%s1566_s26 + $0xc8] sm:$0xff]  ;;  %v1045_v54 = vld [vmem:[%s1566_s26 + $0xd0] sm:$0xff] }
 0x23c   : >> { %1042 = vst [vmem:[%s1562_s21 + $0xc0] sm:$0xff] %v1041_v52  ;;  %1044 = vst [vmem:[%s1562_s21 + $0xc8] sm:$0xff] %v1043_v53  ;;  %v1047_v55 = vld [vmem:[%s1566_s26 + $0xd8] sm:$0xff]  ;;  %v1049_v56 = vld [vmem:[%s1566_s26 + $0xe0] sm:$0xff] }
 0x23d   : >> { %1046 = vst [vmem:[%s1562_s21 + $0xd0] sm:$0xff] %v1045_v54  ;;  %v1051_v57 = vld [vmem:[%s1566_s26 + $0xe8] sm:$0xff]  ;;  %1048 = vst [vmem:[%s1562_s21 + $0xd8] sm:$0xff] %v1047_v55  ;;  %v1053_v58 = vld [vmem:[%s1566_s26 + $0xf0] sm:$0xff] }
 0x23e   : >> { %1050 = vst [vmem:[%s1562_s21 + $0xe0] sm:$0xff] %v1049_v56  ;;  %1052 = vst [vmem:[%s1562_s21 + $0xe8] sm:$0xff] %v1051_v57  ;;  %v1055_v60 = vld [vmem:[%s1566_s26 + $0xf8] sm:$0xff]  ;;  %s2037_s26 = smov %s1968_s24 }
 0x23f   : >> { %1054 = vst [vmem:[%s1562_s21 + $0xf0] sm:$0xff] %v1053_v58  ;;  %1056 = vst [vmem:[%s1562_s21 + $0xf8] sm:$0xff] %v1055_v60  ;;  %s2036_s21 = smov %s1063_s27 }
 0x240 PF: > { %s2009_s28 = sand.u32 31, %s2043_s18   ;;  %s1257_s29 = sshll.u32 %s1901_s16, 8 }
 0x241   : > { %s1068_s30 = scalar_lea.vmem %s1792_s10, %s1257_s29 [#allocation2]   ;;  %s1070_s7 = scalar_lea.vmem %s1895_s14, %s1257_s29  }
 0x242   : > { %p1251_p13 = scmp.le.s32.totalorder %s2009_s28, 0 }
 0x243   : > { %s1576_s8 = smov (!%p1251_p13), %s1070_s7   ;;  %s1580_s9 = smov (!%p1251_p13), %s1068_s30  }
 0x244   : > { %1161 = sbr.rel (%p1251_p13) target bundleno = 597 (0x255), region = 135  ;;  %s1584_s11 = smov (!%p1251_p13), 0  }
 0x245   : > { %s1588_s12 = smov (!%p1251_p13), 0  }
 0x24b LB: >> { %v1080_v61 = vld [vmem:[%s1582_s9] sm:$0xff]  ;;  %s1082_s18 = sadd.s32 1, %s1586_s11  ;;  %s1074_s12 = sadd.s32 1, %s1590_s12   ;;  %s1590_s12 = sphi %s1588_s12, %s1074_s12   ;;  %s1586_s11 = sphi %s1584_s11, %s1585_s11   ;;  %s1582_s9 = sphi %s1580_s9, %s1087_s9   ;;  %s1578_s8 = sphi %s1576_s8, %s1088_s8  }
 0x24c   : >> { %1081 = vst [vmem:[%s1578_s8] sm:$0xff] %v1080_v61  ;;  %p1083_p0 = scmp.ge.s32.totalorder %s1082_s18, %s2009_s28  ;;  %p1073_p1 = scmp.ge.s32.totalorder %s1074_s12, %s2009_s28 }
 0x24e   : >> { %s2047_s18 = smov (%p1083_p0, %s1082_s18), 0  ;;  %1076 = sbr.rel (!%p1073_p1) target bundleno = 587 (0x24b), region = 141 }
 0x24f   : >> { %s1252_s10 = sshll.u32 %s2047_s18, 3  ;;  %s1585_s11 = smov %s2047_s18  }
 0x250   : >> { %s1087_s9 = scalar_lea.vmem %s1068_s30, %s1252_s10 [#allocation2]   ;;  %s1088_s8 = scalar_lea.vmem %s1070_s7, %s1252_s10  }
 0x255 PF: > { %p12_p2 = scmp.ge.s32.totalorder %s1638_s22, 4   ;;  %s2039_s18 = smov %s1554_s19 }
 0x256   : > { %s2040_s19 = smov %s1646_s25  ;;  %s2041_s20 = smov %s1638_s22 }
 0x257   :  { %14 = sbr.rel (!%p12_p2) target bundleno = 2 (0x2), region = 152 }

</bundles_post_ra>
